<compile_context>
chip_gen: v5e
topology: v5e:2x2
jax: 0.10.0
libtpu: 0.0.40
codegen_flags: <defaults>
</compile_context>

<pallas_src>
import functools

import jax
import jax.numpy as jnp
from jax.experimental import pallas as pl
from jax.experimental.pallas import tpu as pltpu


def _masked_conv_matmul_kernel(w_ref, p_ref, o_ref):
    # w_ref : (Cout, Kp)  bf16 masked weight, whole-array resident in VMEM
    #                     (single-buffered, copied once for the whole grid).
    # p_ref : (Kp, TM)    bf16 im2col tile of one batch element (lane-dense).
    # o_ref : (Cout, TM)  f32 tile of the (N, Cout, Ho*Wo) output — lane-dense
    #                     => unmasked vst, and already in NCHW order.
    o_ref[...] = jnp.dot(
        w_ref[...], p_ref[...], preferred_element_type=jnp.float32
    )


def _im2col_nchw(x, kh, kw, stride, padding, dilation):
    """x: (N, C, H, W) -> P of shape (N, C*kh*kw, Ho*Wo) in x.dtype, plus (Ho, Wo).

    K ordering is (c_in, kh, kw), matching weight.reshape(Cout, Cin*KH*KW) (OIHW).
    """
    n, c, h, w = x.shape
    x_p = jnp.pad(x, ((0, 0), (0, 0), (padding, padding), (padding, padding)))
    h_out = (h + 2 * padding - dilation * (kh - 1) - 1) // stride + 1
    w_out = (w + 2 * padding - dilation * (kw - 1) - 1) // stride + 1
    patches = []
    for i in range(kh):
        for j in range(kw):
            hs, ws = i * dilation, j * dilation
            patches.append(
                x_p[:, :, hs : hs + stride * h_out : stride,
                          ws : ws + stride * w_out : stride]
            )
    # (kh*kw, N, C, Ho, Wo) -> (N, C, kh, kw, Ho, Wo) -> (N, K, Ho*Wo)
    cols = jnp.stack(patches, axis=0).reshape(kh, kw, n, c, h_out, w_out)
    cols = jnp.transpose(cols, (2, 3, 0, 1, 4, 5))
    cols = cols.reshape(n, c * kh * kw, h_out * w_out)
    return cols, (h_out, w_out)


def _vmem_budgets():
    """(tile-picker budget, scoped vmem_limit) chosen per TPU generation."""
    try:
        cap = int(pltpu.get_tpu_info().vmem_capacity_bytes)
    except Exception:
        cap = 64 * 1024 * 1024  # be conservative (v7x-class) if query fails
    if cap <= 64 * 1024 * 1024:          # v7x: 64 MiB physical per TensorCore
        return 24 * 1024 * 1024, 32 * 1024 * 1024
    return 64 * 1024 * 1024, 96 * 1024 * 1024   # v5e / v6e: 128 MiB physical


def _pick_tm(howo_pad, n_batch, k_pad, c_out, budget_bytes):
    """Largest M tile that divides the (128-padded) per-batch M, fits the VMEM
    budget, and (preferably) yields an even total grid-step count (v7x 2 TCs)."""
    def need(tm):
        # double-buffered bf16 P tile + double-buffered f32 out tile
        # + single-buffered resident bf16 masked weight.
        return 2 * k_pad * tm * 2 + 2 * c_out * tm * 4 + c_out * k_pad * 2

    cands = [t for t in (2048, 1024, 512, 256, 128)
             if t <= howo_pad and howo_pad % t == 0 and need(t) <= budget_bytes]
    if not cands:
        # TODO(synk): K / Cout tiling instead of silently exceeding the budget.
        cands = [128]
    for t in cands:  # prefer even total steps for v7x core balance
        if (n_batch * (howo_pad // t)) % 2 == 0:
            return t, need(t)
    return cands[0], need(cands[0])


@functools.partial(jax.jit, static_argnames=("stride", "padding", "dilation"))
def masked_conv2d_forward(x, weight, mask, *, stride=1, padding=0, dilation=1):
    """Forward of MyStandaloneConv2d: conv2d(x, weight * mask), bias=False.

    x      : (N, Cin, H, W)      float32, NCHW (torch convention)
    weight : (Cout, Cin, KH, KW) float32, OIHW (torch convention)
    mask   : same shape as weight (unstructured binary mask)
    returns: (N, Cout, Ho, Wo)   float32, NCHW
    """
    n = x.shape[0]
    c_out, c_in, kh, kw = weight.shape
    k = c_in * kh * kw

    # Mask applied once (grid-invariant), folded into the weight
    # (equivalent of UnstructuredMask.apply on the conv weight).
    w_masked = (weight * mask).reshape(c_out, k)

    # bf16 im2col built directly (no f32 P materialization / extra cast pass).
    p, (h_out, w_out) = _im2col_nchw(
        x.astype(jnp.bfloat16), kh, kw, stride, padding, dilation
    )
    howo = h_out * w_out

    # Pad K to a multiple of 16 (clean bf16 sublane packing); zero rows add 0.
    # Pad M (= Ho*Wo, the lane dim) only to the 128-lane requirement.
    k_extra = (-k) % 16
    howo_extra = (-howo) % 128
    if k_extra or howo_extra:
        p = jnp.pad(p, ((0, 0), (0, k_extra), (0, howo_extra)))
    if k_extra:
        w_masked = jnp.pad(w_masked, ((0, 0), (0, k_extra)))
    k_pad = k + k_extra
    howo_pad = howo + howo_extra

    w_bf16 = w_masked.astype(jnp.bfloat16)

    budget, limit_cap = _vmem_budgets()
    tm, vmem_need = _pick_tm(howo_pad, n, k_pad, c_out, budget)
    vmem_limit = int(min(limit_cap, max(16 * 1024 * 1024, 8 * vmem_need)))

    grid = (n, howo_pad // tm)

    cost = pl.CostEstimate(
        flops=2 * n * howo_pad * k_pad * c_out,
        transcendentals=0,
        bytes_accessed=int(p.size * 2 + w_bf16.size * 2
                           + n * c_out * howo_pad * 4),
    )

    out = pl.pallas_call(
        _masked_conv_matmul_kernel,
        out_shape=jax.ShapeDtypeStruct((n, c_out, howo_pad), jnp.float32),
        grid_spec=pltpu.PrefetchScalarGridSpec(
            num_scalar_prefetch=0,
            grid=grid,
            in_specs=[
                # masked weight: whole array resident in VMEM, single-buffered.
                pl.BlockSpec(memory_space=pltpu.MemorySpace.VMEM),
                # im2col tile of one batch element; lane dim tm is 128-dense.
                pl.BlockSpec((None, k_pad, tm), lambda b, i: (b, 0, i)),
            ],
            # Output written directly in (N, Cout, Ho*Wo) layout -> NCHW via a
            # free reshape; no post-kernel transpose pass.
            out_specs=pl.BlockSpec((None, c_out, tm), lambda b, i: (b, 0, i)),
        ),
        compiler_params=pltpu.CompilerParams(
            dimension_semantics=("parallel", "parallel"),
            vmem_limit_bytes=vmem_limit,
        ),
        cost_estimate=cost,
    )(w_bf16, p)

    out = out[:, :, :howo].reshape(n, c_out, h_out, w_out)
    return out


def get_pruned_conv_flops(output_shape, weight_mask):
    """FLOP accounting used by my_forward (output_mask = ones_like(res)).

    Host-side side-channel; keep off the hot path (call after block_until_ready).
    """
    n, _, h_out, w_out = output_shape
    channel_output_mask = float(n * h_out * w_out)              # ones summed over (N,H,W)
    channel_flops = jnp.sum(weight_mask, axis=(1, 2, 3)) * 2.0  # per out-channel
    return float(jnp.sum(channel_output_mask * channel_flops))


if __name__ == "__main__":
    # Module config: Conv2d(in=4, out=8, kernel=3, stride=1, padding=1, bias=False)
    in_channels, out_channels, kernel_size = 4, 8, 3
    stride, padding, dilation = 1, 1, 1

    key = jax.random.PRNGKey(0)
    kx, kw_, km = jax.random.split(key, 3)

    x = jax.random.normal(kx, (2, in_channels, 16, 16), dtype=jnp.float32)
    weight = jax.random.normal(
        kw_, (out_channels, in_channels, kernel_size, kernel_size), dtype=jnp.float32
    ) * 0.1
    # Deterministic unstructured binary mask (~80% kept).
    mask = (jax.random.uniform(km, weight.shape) < 0.8).astype(jnp.float32)

    out = masked_conv2d_forward(
        x, weight, mask, stride=stride, padding=padding, dilation=dilation
    )
    out = jax.block_until_ready(out)

    w_masked = weight * mask

    # Apples-to-apples reference: XLA conv with bf16 operands + f32 accumulation
    # (matches the kernel's MXU dtype choice).
    ref_bf16 = jax.lax.conv_general_dilated(
        x.astype(jnp.bfloat16), w_masked.astype(jnp.bfloat16),
        window_strides=(stride, stride),
        padding=[(padding, padding), (padding, padding)],
        rhs_dilation=(dilation, dilation),
        dimension_numbers=("NCHW", "OIHW", "NCHW"),
        preferred_element_type=jnp.float32,
    )
    # Full-f32 reference for semantic sanity (loose tolerance: bf16 operands).
    ref_f32 = jax.lax.conv_general_dilated(
        x, w_masked,
        window_strides=(stride, stride),
        padding=[(padding, padding), (padding, padding)],
        rhs_dilation=(dilation, dilation),
        dimension_numbers=("NCHW", "OIHW", "NCHW"),
    )

    assert out.shape == ref_f32.shape == (2, out_channels, 16, 16)
    assert jnp.allclose(out, ref_bf16, atol=2e-3, rtol=2e-3)
    assert jnp.allclose(out, ref_f32, atol=5e-2, rtol=5e-2)

    # my_forward FLOP bookkeeping (scalar side-channel, off the hot path).
    _flops = get_pruned_conv_flops(out.shape, mask)

    print("KERNEL_OK")
</pallas_src>

<mosaic_0001>
module attributes {stable_mosaic.version = 11 : i64} {
  func.func @_masked_conv_matmul_kernel(%arg0: i32, %arg1: i32, %arg2: memref<8x48xbf16, #tpu.memory_space<vmem>>, %arg3: memref<1x48x256xbf16, #tpu.memory_space<vmem>>, %arg4: memref<1x8x256xf32, #tpu.memory_space<vmem>>) attributes {dimension_semantics = [#tpu.dimension_semantics<parallel>, #tpu.dimension_semantics<parallel>], iteration_bounds = array<i64: 2, 1>, scalar_prefetch = 0 : i64, scratch_operands = 0 : i64, tpu.core_type = #tpu.core_type<tc>, window_params = [{pipeline_mode = #tpu.pipeline_mode<synchronous>, transform_indices = @transform_0, window_bounds = array<i64: 8, 48>}, {transform_indices = @transform_1, window_bounds = array<i64: 1, 48, 256>}, {transform_indices = @transform_2, window_bounds = array<i64: 1, 8, 256>}]} {
    %c0 = arith.constant 0 : index
    %c0_0 = arith.constant 0 : index
    %0 = vector.load %arg2[%c0, %c0_0] : memref<8x48xbf16, #tpu.memory_space<vmem>>, vector<8x48xbf16>
    %c0_1 = arith.constant 0 : index
    %c0_2 = arith.constant 0 : index
    %c0_3 = arith.constant 0 : index
    %1 = vector.load %arg3[%c0_1, %c0_2, %c0_3] : memref<1x48x256xbf16, #tpu.memory_space<vmem>>, vector<1x48x256xbf16>
    %2 = vector.shape_cast %1 : vector<1x48x256xbf16> to vector<48x256xbf16>
    %cst = arith.constant dense<0.000000e+00> : vector<8x256xf32>
    %3 = tpu.matmul %0, %2, %cst {dimension_numbers = #tpu.dot_dimension_numbers<[1], [0], [0], [1], [0, 0, 1, 1], [], []>} : vector<8x48xbf16>, vector<48x256xbf16>, vector<8x256xf32> -> vector<8x256xf32>
    %c0_4 = arith.constant 0 : index
    %c0_5 = arith.constant 0 : index
    %c0_6 = arith.constant 0 : index
    %4 = vector.load %arg4[%c0_4, %c0_5, %c0_6] : memref<1x8x256xf32, #tpu.memory_space<vmem>>, vector<1x8x256xf32>
    %5 = vector.shape_cast %4 : vector<1x8x256xf32> to vector<8x256xf32>
    %6 = vector.shape_cast %3 : vector<8x256xf32> to vector<1x8x256xf32>
    tpu.vector_store %arg4[%c0_4, %c0_5, %c0_6], %6 {strides = array<i32>} : memref<1x8x256xf32, #tpu.memory_space<vmem>>, vector<1x8x256xf32>,
    return
  }
  func.func @transform_0(%arg0: i32, %arg1: i32) -> (i32, i32) {
    %c0_i32 = arith.constant 0 : i32
    %c0_i32_0 = arith.constant 0 : i32
    %c0_i32_1 = arith.constant 0 : i32
    return %c0_i32, %c0_i32_0 : i32, i32
  }
  func.func @transform_1(%arg0: i32, %arg1: i32) -> (i32, i32, i32) {
    %c0_i32 = arith.constant 0 : i32
    %c0_i32_0 = arith.constant 0 : i32
    return %arg0, %c0_i32, %arg1 : i32, i32, i32
  }
  func.func @transform_2(%arg0: i32, %arg1: i32) -> (i32, i32, i32) {
    %c0_i32 = arith.constant 0 : i32
    %c0_i32_0 = arith.constant 0 : i32
    return %arg0, %c0_i32, %arg1 : i32, i32, i32
  }
}

</mosaic_0001>

<bundles_post_ra>
// kernel: masked_conv2d_forward.1
= control target key start
LH: loop header
LB: loop body
LE: loop exit
PB: predicated region body
PF: predicated region fallthrough
CT: control target
= control target key end

     0   :  { %s447_s9 = smov 0   ;;  %s449_s10 = smov 0   ;;  %s487_s0 = inlined_call_operand.vmem [shape: bf16[8,48], index: 0, kind: input, shape index: {}]   ;;  %s488_s1 = inlined_call_operand.vmem [shape: bf16[2,48,256], index: 1, kind: input, shape index: {}]   ;;  %s489_s2 = inlined_call_operand.vmem [shape: f32[2,8,256], index: 2, kind: output, shape index: {}]  }
   0x1   :  { %s451_s11 = smov 0  }
   0x2 LB: > { %s24_s12 = sadd.s32 1, %s426_s10  ;;  %p344_p0 = scmp.ge.s32.totalorder %s430_s11, 1  ;;  %s430_s11 = sphi %s451_s11, %s12_s11   ;;  %s426_s10 = sphi %s449_s10, %s491_s10   ;;  %s422_s9 = sphi %s447_s9, %s490_s9  }
   0x3   : > { %p26_p1 = scmp.ge.s32.totalorder %s24_s12, 2  ;;  %p133_p2 = scmp.lt.s32.totalorder %s430_s11, 3 }
   0x5   : > { %s493_s12 = smov (%p26_p1, %s24_s12), 0  ;;  %p134_p3 = pnand %p344_p0, %p133_p2 }
   0x6   : > { %p164_p4 = scmp.lt.s32.totalorder (!%p134_p3), %s422_s9, 1 }
   0x7   : > { %137 = sbr.rel (%p134_p3) target bundleno = 165 (0xa5), region = 28 }
   0xc   : > { %s495_s9 = smov (!%p164_p4, %s422_s9), 1  ;;  %v184_v18 = vld [vmem:[%s487_s0] sm:$0xf]  ;;  %vm221_vm0 = vcmask 392192  }
   0xd   : > { %s383_s13 = smul.u32 48, %s495_s9  ;;  %s376_s19 = sshll.u32 %s495_s9, 4 }
   0xe   : > { %s181_s22 = scalar_lea.vmem %s489_s2, %s376_s19 }
   0xf   : > { %s171_s16 = scalar_lea.vmem %s488_s1, %s383_s13 }
  0x10   : > { %v366_v0 = vld [vmem:[%s171_s16 + $0x20] sm:$0xf]  ;;  %v382_v1 = vld [vmem:[%s171_s16 + $0x24] sm:$0xf0]  ;;  %v381_v2 = vld [vmem:[%s171_s16 + $0x24] sm:$0xf] }
  0x11   : > { %v367_v3 = vor.u32 %v382_v1, %v366_v0  ;;  %v368_v4 = vld [vmem:[%s171_s16 + $0x28] sm:$0xf0]  ;;  %v358_v5 = vld [vmem:[%s171_s16 + $0x10] sm:$0xf]  ;;  %v380_v6 = vld [vmem:[%s171_s16 + $0x14] sm:$0xf0] }
  0x12   : > { %v371_v7 = vor.u32 %v381_v2, %v368_v4  ;;  %v379_v8 = vld [vmem:[%s171_s16 + $0x14] sm:$0xf]  ;;  %v360_v9 = vld [vmem:[%s171_s16 + $0x18] sm:$0xf0]  ;;  %v359_v10 = vor.u32 %v380_v6, %v358_v5  ;;  %v350_v12 = vld [vmem:[%s171_s16] sm:$0xf] }
  0x13   : > { %230 = vmatpush.bf16.msra.mxu0 %v367_v3  ;;  %v363_v11 = vor.u32 %v379_v8, %v360_v9  ;;  %v378_v13 = vld [vmem:[%s171_s16 + $0x4] sm:$0xf0]  ;;  %v377_v14 = vld [vmem:[%s171_s16 + $0x4] sm:$0xf]  ;;  %v352_v15 = vld [vmem:[%s171_s16 + $0x8] sm:$0xf0] }
  0x14   : > { %243 = vmatpush.bf16.msra.mxu1 %v371_v7  ;;  %v351_v16 = vor.u32 %v378_v13, %v350_v12  ;;  %v355_v17 = vor.u32 %v377_v14, %v352_v15 }
  0x17   : > { %231 = vmatpush.bf16.msra.mxu0 %v359_v10 }
  0x18   : > { %244 = vmatpush.bf16.msra.mxu1 %v363_v11 }
  0x1b   : > { %232 = vmatpush.bf16.msra.mxu0 %v351_v16 }
  0x1c   : > { %245 = vmatpush.bf16.msra.mxu1 %v355_v17 }
  0x1e   : > { %372 = vmatmul.msk.bf16.vlgmr.msra.gmra.mxu0 %vm221_vm0, %v184_v18 }
  0x1f   : > { %373 = vmatmul.msk.bf16.vlgmr.msra.gmra.mxu1 %vm221_vm0, %v184_v18 }
  0x9b   : > { %v234_v19 = vpop.f32.mrf.mxu0 }
  0x9c   : > { %251 = vst [vmem:[%s181_s22] sm:$0xff] %v234_v19  ;;  %v247_v20 = vpop.f32.mrf.mxu1 }
  0x9d   : > { %252 = vst [vmem:[%s181_s22 + $0x8] sm:$0xff] %v247_v20 }
  0xa3   : > { %v236_v21 = vpop.f32.mrf.mxu0 }
  0xa4   : > { %v249_v22 = vpop.f32.mrf.mxu1 }
  0xa5 PF: > { %s12_s11 = sadd.s32 1, %s430_s11   ;;  %s490_s9 = smov %s426_s10 }
  0xa6   : > { %p9_p5 = scmp.ge.s32.totalorder %s12_s11, 4   ;;  %s491_s10 = smov %s493_s12 }
  0xa8   :  { %11 = sbr.rel (!%p9_p5) target bundleno = 2 (0x2), region = 58 }

</bundles_post_ra>
